<compile_context>
chip_gen: v7x
topology: tpu7x:2x2x1
jax: 0.10.0
libtpu: 0.0.40
codegen_flags: <defaults>
</compile_context>

<pallas_src>
import jax
import jax.numpy as jnp
from jax import lax
from jax.experimental import pallas as pl
from jax.experimental.pallas import tpu as pltpu

EPS = 1e-5
_LANE = 128
_MIB = 1024 * 1024


def _round_up(x, m):
    return ((x + m - 1) // m) * m


def _pad_to(a, shape):
    pads = [(0, t - s) for s, t in zip(a.shape, shape)]
    return jnp.pad(a, pads)


def _gen_defaults():
    """Generation-dependent scoped-VMEM limit and default M tile."""
    try:
        info = pltpu.get_tpu_info()
        phys = getattr(info, "vmem_capacity_bytes", 64 * _MIB)
    except Exception:
        phys = 64 * _MIB
    if phys >= 128 * _MIB:            # v5e / v6e: 128 MiB physical VMEM
        return 64 * _MIB, 1024
    return 32 * _MIB, 512             # v7x: 64 MiB per TensorCore


# ---------------------------------------------------------------------------
# Kernel 1 / 3:  [optional fused BN+ReLU on input] -> 1x1-conv matmul
#                -> per-tile (sum, sumsq) partial statistics
# ---------------------------------------------------------------------------
def _make_matmul_stats_kernel(fuse_input_bn, m_true):
    def kernel(*refs):
        if fuse_input_bn:
            scale_ref, shift_ref, x_ref, w_ref, y_ref, stats_ref = refs
        else:
            x_ref, w_ref, y_ref, stats_ref = refs
        i = pl.program_id(0)

        x = x_ref[...]
        if fuse_input_bn:
            # previous stage's BN + ReLU, fused on the input side (f32 math)
            act = jnp.maximum(
                x.astype(jnp.float32) * scale_ref[...] + shift_ref[...], 0.0)
            # rows past the true M are padding; zero them so they cannot
            # pollute this stage's output or its BN statistics
            tm = x_ref.shape[0]
            rows = i * tm + lax.broadcasted_iota(jnp.int32, (tm, 1), 0)
            x = jnp.where(rows < m_true, act, 0.0)

        y = jnp.dot(x.astype(w_ref.dtype), w_ref[...],
                    preferred_element_type=jnp.float32)
        y_ref[...] = y.astype(y_ref.dtype)

        # per-tile partial stats: one dense write (no resident accumulator,
        # no read-modify-write), reduced in the wrapper.
        s1 = jnp.sum(y, axis=0, keepdims=True)
        s2 = jnp.sum(y * y, axis=0, keepdims=True)
        stats_ref[...] = jnp.concatenate([s1, s2], axis=0)

    return kernel


def _matmul_bn_stats(x2d, w, scale, shift, *, tile_m, m_true, compute_dtype,
                     vmem_limit):
    m_pad, k = x2d.shape
    _, n_out = w.shape
    n_tiles = m_pad // tile_m
    fuse = scale is not None
    kernel = _make_matmul_stats_kernel(fuse, m_true)

    in_specs, args = [], []
    if fuse:
        in_specs += [pl.BlockSpec((1, k), lambda i: (0, 0)),
                     pl.BlockSpec((1, k), lambda i: (0, 0))]
        args += [scale, shift]
    # TODO(synk): mark the constant-index weight / scale / shift blocks
    # single-buffered (pipeline_mode=pl.Buffered(1)) once verified on the
    # target jax version; frees one weight-sized VMEM buffer.
    in_specs += [pl.BlockSpec((tile_m, k), lambda i: (i, 0)),
                 pl.BlockSpec((k, n_out), lambda i: (0, 0))]   # weights resident
    args += [x2d, w]

    itemsize = jnp.dtype(compute_dtype).itemsize
    cost = pl.CostEstimate(
        flops=2 * m_pad * k * n_out,
        transcendentals=0,
        bytes_accessed=(m_pad * k + k * n_out + m_pad * n_out) * itemsize)

    y, stats = pl.pallas_call(
        kernel,
        grid=(n_tiles,),
        in_specs=in_specs,
        out_specs=(pl.BlockSpec((tile_m, n_out), lambda i: (i, 0)),
                   pl.BlockSpec((None, 2, n_out), lambda i: (i, 0, 0))),
        out_shape=(jax.ShapeDtypeStruct((m_pad, n_out), compute_dtype),
                   jax.ShapeDtypeStruct((n_tiles, 2, n_out), jnp.float32)),
        compiler_params=pltpu.CompilerParams(
            dimension_semantics=("parallel",),     # megacore-shardable on v7x
            vmem_limit_bytes=vmem_limit),
        cost_estimate=cost,
    )(*args)
    return y, jnp.sum(stats, axis=0)


# ---------------------------------------------------------------------------
# Kernel 2:  fused BN1+ReLU -> 3x3 conv (pad 1) via in-VMEM halo and
#            3 fused-tap MXU matmuls (K = 3*C) -> per-image partial stats
# ---------------------------------------------------------------------------
def _make_conv2_kernel(H, W, P):
    def kernel(scale_ref, shift_ref, x_ref, w_ref, y_ref, stats_ref, hp_ref):
        # fused bn1 + relu on this image's conv1 output (f32 math)
        h = jnp.maximum(
            x_ref[...].astype(jnp.float32) * scale_ref[...] + shift_ref[...],
            0.0)

        # 1-pixel zero border in the (compute-dtype) halo scratch. Only the
        # border strips are zeroed (the interior is fully overwritten), and
        # they are zeroed every step: with "parallel" grid sharding a core's
        # first iteration is not necessarily program_id == 0.
        z_row = jnp.zeros((1, W + 2, P), hp_ref.dtype)
        z_col = jnp.zeros((H, 1, P), hp_ref.dtype)
        hp_ref[0:1, :, :] = z_row
        hp_ref[H + 1:H + 2, :, :] = z_row
        hp_ref[1:H + 1, 0:1, :] = z_col
        hp_ref[1:H + 1, W + 1:W + 2, :] = z_col
        hp_ref[1:H + 1, 1:W + 1, :] = h.astype(hp_ref.dtype).reshape(H, W, P)

        # 3x3 conv = 3 matmuls (one per kh) with the 3 kw taps fused along K:
        # patch (H*W, 3*P) @ w2[kh] (3*P, P), f32 accumulation.
        acc = jnp.zeros((H * W, P), jnp.float32)
        for kh in range(3):
            rows = hp_ref[kh:kh + H, :, :]                        # (H, W+2, P)
            patch = jnp.concatenate(
                [rows[:, 0:W, :], rows[:, 1:W + 1, :], rows[:, 2:W + 2, :]],
                axis=-1).reshape(H * W, 3 * P)
            acc = acc + jnp.dot(patch, w_ref[kh],
                                preferred_element_type=jnp.float32)

        y_ref[...] = acc.astype(y_ref.dtype)
        s1 = jnp.sum(acc, axis=0, keepdims=True)
        s2 = jnp.sum(acc * acc, axis=0, keepdims=True)
        stats_ref[...] = jnp.concatenate([s1, s2], axis=0)

    return kernel


def _conv3x3_bn_stats(y1_2d, w2, scale, shift, *, N, H, W, compute_dtype,
                      vmem_limit):
    # TODO(synk): for large H*W (e.g. 56x56 stages) tile over H rows with a
    # 2-row halo per tile so the per-step block fits v7x's 64 MiB comfortably.
    P = w2.shape[-1]
    HW = H * W
    kernel = _make_conv2_kernel(H, W, P)

    itemsize = jnp.dtype(compute_dtype).itemsize
    cost = pl.CostEstimate(
        flops=2 * N * HW * 9 * P * P,
        transcendentals=0,
        bytes_accessed=(2 * N * HW * P + 9 * P * P) * itemsize)

    y, stats = pl.pallas_call(
        kernel,
        grid=(N,),
        in_specs=[pl.BlockSpec((1, P), lambda n: (0, 0)),
                  pl.BlockSpec((1, P), lambda n: (0, 0)),
                  pl.BlockSpec((HW, P), lambda n: (n, 0)),
                  pl.BlockSpec((3, 3 * P, P), lambda n: (0, 0, 0))],  # resident
        out_specs=(pl.BlockSpec((HW, P), lambda n: (n, 0)),
                   pl.BlockSpec((None, 2, P), lambda n: (n, 0, 0))),
        out_shape=(jax.ShapeDtypeStruct((N * HW, P), compute_dtype),
                   jax.ShapeDtypeStruct((N, 2, P), jnp.float32)),
        scratch_shapes=[pltpu.VMEM((H + 2, W + 2, P), compute_dtype)],
        compiler_params=pltpu.CompilerParams(
            dimension_semantics=("parallel",),
            vmem_limit_bytes=vmem_limit),
        cost_estimate=cost,
    )(scale, shift, y1_2d, w2)
    return y, jnp.sum(stats, axis=0)


# ---------------------------------------------------------------------------
# Kernel 4: BN3 + residual add + ReLU (elementwise, M-tiled, parallel)
# ---------------------------------------------------------------------------
def _bn_add_relu_kernel(scale_ref, shift_ref, y_ref, r_ref, o_ref):
    y = y_ref[...].astype(jnp.float32) * scale_ref[...] + shift_ref[...]
    o_ref[...] = jnp.maximum(y + r_ref[...].astype(jnp.float32),
                             0.0).astype(o_ref.dtype)


def _bn_add_relu(y3, residual, scale, shift, *, tile_m, vmem_limit, out_dtype):
    m_pad, c = y3.shape
    return pl.pallas_call(
        _bn_add_relu_kernel,
        grid=(m_pad // tile_m,),
        in_specs=[pl.BlockSpec((1, c), lambda i: (0, 0)),
                  pl.BlockSpec((1, c), lambda i: (0, 0)),
                  pl.BlockSpec((tile_m, c), lambda i: (i, 0)),
                  pl.BlockSpec((tile_m, c), lambda i: (i, 0))],
        out_specs=pl.BlockSpec((tile_m, c), lambda i: (i, 0)),
        out_shape=jax.ShapeDtypeStruct((m_pad, c), out_dtype),
        compiler_params=pltpu.CompilerParams(
            dimension_semantics=("parallel",),
            vmem_limit_bytes=vmem_limit),
    )(scale, shift, y3, residual)


# ---------------------------------------------------------------------------
# Per-channel BatchNorm fold: (sum, sumsq) -> (scale, shift)   (tiny, plain JAX)
# ---------------------------------------------------------------------------
def _bn_scale_shift(stats, gamma, beta, m):
    mean = stats[0] / m
    ex2 = stats[1] / m
    var = jnp.maximum(ex2 - mean * mean, 0.0)
    scale = gamma * lax.rsqrt(var + EPS)
    shift = beta - mean * scale
    return scale[None, :].astype(jnp.float32), shift[None, :].astype(jnp.float32)


# ---------------------------------------------------------------------------
# Full Bottleneck forward
# ---------------------------------------------------------------------------
def bottleneck_forward(x_nchw, params, *, compute_dtype=jnp.bfloat16,
                       tile_m=None, out_dtype=None):
    N, Cin, H, W = x_nchw.shape
    P = params["w1"].shape[0]
    if Cin != 4 * P:
        raise ValueError("downsample=None requires inplanes == 4 * planes")
    if W % 8 != 0:
        # TODO(synk): lift by masking padded columns inside the conv2 kernel.
        raise ValueError("conv2 kernel assumes W % 8 == 0")

    vmem_limit, default_tm = _gen_defaults()
    if tile_m is None:
        tile_m = default_tm
    if out_dtype is None:
        out_dtype = jnp.float32

    Cin_p = _round_up(Cin, _LANE)
    P_p = _round_up(P, _LANE)
    Cout = 4 * P
    Cout_p = Cin_p                       # == round_up(Cout, 128) since Cout == Cin

    M = N * H * W
    # multiple of 16 (bf16 sublane packing); when tm | M the inter-stage
    # slice / pad ops below are no-ops.
    tm = min(_round_up(tile_m, 16), _round_up(M, 16))
    M_p = _round_up(M, tm)

    # ----- one-time weight / affine packing (lane-dense, zero padded) -------
    # NOTE: padded gamma/beta lanes MUST stay zero so padded channels stay
    # inert through every BN stage.
    w1 = _pad_to(params["w1"][:, :, 0, 0].T, (Cin_p, P_p)).astype(compute_dtype)
    w2_t = _pad_to(jnp.transpose(params["w2"], (2, 3, 1, 0)), (3, 3, P_p, P_p))
    w2 = w2_t.reshape(3, 3 * P_p, P_p).astype(compute_dtype)   # kw taps fused on K
    w3 = _pad_to(params["w3"][:, :, 0, 0].T, (P_p, Cout_p)).astype(compute_dtype)
    g1 = _pad_to(params["g1"], (P_p,));    b1 = _pad_to(params["b1"], (P_p,))
    g2 = _pad_to(params["g2"], (P_p,));    b2 = _pad_to(params["b2"], (P_p,))
    g3 = _pad_to(params["g3"], (Cout_p,)); b3 = _pad_to(params["b3"], (Cout_p,))

    # ----- input layout: NCHW -> NHWC -> (M, C), pad rows + channels --------
    x2d = jnp.transpose(x_nchw, (0, 2, 3, 1)).reshape(M, Cin)
    x2d = _pad_to(x2d, (M_p, Cin_p)).astype(compute_dtype)

    # stage 1: conv1 (1x1 matmul) + bn1 statistics
    y1, st1 = _matmul_bn_stats(x2d, w1, None, None, tile_m=tm, m_true=M,
                               compute_dtype=compute_dtype, vmem_limit=vmem_limit)
    sc1, sh1 = _bn_scale_shift(st1, g1, b1, M)

    # stage 2: bn1+relu fused into 3x3 conv2 (in-VMEM halo) + bn2 statistics.
    # conv2 consumes y1 directly as (M_p, P_p) with one (H*W, P_p) block per
    # image -- no wrapper reshape/copy between stages 1 and 2.
    y2, st2 = _conv3x3_bn_stats(y1, w2, sc1, sh1, N=N, H=H, W=W,
                                compute_dtype=compute_dtype,
                                vmem_limit=vmem_limit)
    sc2, sh2 = _bn_scale_shift(st2, g2, b2, M)

    # stage 3: bn2+relu fused into conv3 (1x1 matmul) + bn3 statistics
    y2p = _pad_to(y2, (M_p, P_p))        # no-op when tm divides M
    y3, st3 = _matmul_bn_stats(y2p, w3, sc2, sh2, tile_m=tm, m_true=M,
                               compute_dtype=compute_dtype, vmem_limit=vmem_limit)
    sc3, sh3 = _bn_scale_shift(st3, g3, b3, M)

    # stage 4: bn3 + residual add + relu (residual is the compute_dtype x2d)
    out2d = _bn_add_relu(y3, x2d, sc3, sh3, tile_m=tm, vmem_limit=vmem_limit,
                         out_dtype=out_dtype)

    out = out2d[:M, :Cout].reshape(N, H, W, Cout)
    return jnp.transpose(out, (0, 3, 1, 2))


# ---------------------------------------------------------------------------
# Pure-JAX reference (NCHW, PyTorch training-mode forward semantics)
# ---------------------------------------------------------------------------
def bottleneck_reference(x, params):
    def conv(x, w, pad=0):
        return lax.conv_general_dilated(
            x, w, (1, 1), [(pad, pad), (pad, pad)],
            dimension_numbers=("NCHW", "OIHW", "NCHW"))

    def bn(x, g, b):
        mean = jnp.mean(x, axis=(0, 2, 3), keepdims=True)
        var = jnp.mean(jnp.square(x - mean), axis=(0, 2, 3), keepdims=True)
        xn = (x - mean) * lax.rsqrt(var + EPS)
        return xn * g[None, :, None, None] + b[None, :, None, None]

    out = jnp.maximum(bn(conv(x, params["w1"]), params["g1"], params["b1"]), 0.0)
    out = jnp.maximum(bn(conv(out, params["w2"], pad=1), params["g2"], params["b2"]), 0.0)
    out = bn(conv(out, params["w3"]), params["g3"], params["b3"])
    return jnp.maximum(out + x, 0.0)


# ---------------------------------------------------------------------------
if __name__ == "__main__":
    N, H, W = 2, 16, 16
    planes = 4
    inplanes = planes * 4          # residual add requires this when downsample=None

    key = jax.random.PRNGKey(0)
    ks = jax.random.split(key, 8)

    params = {
        # conv weights in PyTorch OIHW layout
        "w1": 0.1 * jax.random.normal(ks[0], (planes, inplanes, 1, 1), jnp.float32),
        "w2": 0.1 * jax.random.normal(ks[1], (planes, planes, 3, 3), jnp.float32),
        "w3": 0.1 * jax.random.normal(ks[2], (planes * 4, planes, 1, 1), jnp.float32),
        # batchnorm affine params
        "g1": 1.0 + 0.1 * jax.random.normal(ks[3], (planes,), jnp.float32),
        "b1": 0.1 * jax.random.normal(ks[4], (planes,), jnp.float32),
        "g2": 1.0 + 0.1 * jax.random.normal(ks[5], (planes,), jnp.float32),
        "b2": 0.1 * jax.random.normal(ks[6], (planes,), jnp.float32),
        "g3": jnp.ones((planes * 4,), jnp.float32),
        "b3": jnp.zeros((planes * 4,), jnp.float32),
    }

    x = jax.random.normal(ks[7], (N, inplanes, H, W), jnp.float32)

    ref = jax.block_until_ready(bottleneck_reference(x, params))

    # f32 compute path: tight-tolerance semantics check (tile_m divides M,
    # so inter-stage pads are no-ops).
    out_f32 = jax.block_until_ready(
        bottleneck_forward(x, params, compute_dtype=jnp.float32, tile_m=128,
                           out_dtype=jnp.float32))
    assert out_f32.shape == (N, inplanes, H, W), out_f32.shape
    assert bool(jnp.allclose(out_f32, ref, atol=2e-3, rtol=2e-3)), "f32 mismatch"

    # bf16 MXU perf path: bf16 output, tile_m=192 (multiple of 16, does NOT
    # divide M=512) exercises M padding + row masking in the fused-BN stage.
    out_bf16 = jax.block_until_ready(
        bottleneck_forward(x, params, compute_dtype=jnp.bfloat16, tile_m=192,
                           out_dtype=jnp.bfloat16))
    assert out_bf16.shape == (N, inplanes, H, W), out_bf16.shape
    assert bool(jnp.allclose(out_bf16.astype(jnp.float32), ref,
                             atol=5e-2, rtol=5e-2)), "bf16 mismatch"

    print("KERNEL_OK")
</pallas_src>

<mosaic_0001>
module attributes {stable_mosaic.version = 11 : i64} {
  func.func @kernel(%arg0: i32, %arg1: memref<128x128xf32, #tpu.memory_space<vmem>>, %arg2: memref<128x128xf32, #tpu.memory_space<vmem>>, %arg3: memref<128x128xf32, #tpu.memory_space<vmem>>, %arg4: memref<1x2x128xf32, #tpu.memory_space<vmem>>) attributes {dimension_semantics = [#tpu.dimension_semantics<parallel>], iteration_bounds = array<i64: 4>, scalar_prefetch = 0 : i64, scratch_operands = 0 : i64, tpu.core_type = #tpu.core_type<tc>, window_params = [{transform_indices = @transform_0, window_bounds = array<i64: 128, 128>}, {pipeline_mode = #tpu.pipeline_mode<synchronous>, transform_indices = @transform_1, window_bounds = array<i64: 128, 128>}, {transform_indices = @transform_2, window_bounds = array<i64: 128, 128>}, {transform_indices = @transform_3, window_bounds = array<i64: 1, 2, 128>}]} {
    %c0 = arith.constant 0 : index
    %c0_0 = arith.constant 0 : index
    %0 = vector.load %arg1[%c0, %c0_0] : memref<128x128xf32, #tpu.memory_space<vmem>>, vector<128x128xf32>
    %c0_1 = arith.constant 0 : index
    %c0_2 = arith.constant 0 : index
    %1 = vector.load %arg2[%c0_1, %c0_2] : memref<128x128xf32, #tpu.memory_space<vmem>>, vector<128x128xf32>
    %cst = arith.constant dense<0.000000e+00> : vector<128x128xf32>
    %2 = tpu.matmul %0, %1, %cst {dimension_numbers = #tpu.dot_dimension_numbers<[1], [0], [0], [1], [0, 0, 1, 1], [], []>} : vector<128x128xf32>, vector<128x128xf32>, vector<128x128xf32> -> vector<128x128xf32>
    %c0_3 = arith.constant 0 : index
    %c0_4 = arith.constant 0 : index
    %3 = vector.load %arg3[%c0_3, %c0_4] : memref<128x128xf32, #tpu.memory_space<vmem>>, vector<128x128xf32>
    tpu.vector_store %arg3[%c0_3, %c0_4], %2 {strides = array<i32>} : memref<128x128xf32, #tpu.memory_space<vmem>>, vector<128x128xf32>,
    %cst_5 = arith.constant dense<0.000000e+00> : vector<128xf32>
    %4 = vector.multi_reduction <add>, %2, %cst_5 [0] : vector<128x128xf32> to vector<128xf32>
    %5 = vector.shape_cast %4 : vector<128xf32> to vector<1x128xf32>
    %6 = arith.mulf %2, %2 : vector<128x128xf32>
    %cst_6 = arith.constant dense<0.000000e+00> : vector<128xf32>
    %7 = vector.multi_reduction <add>, %6, %cst_6 [0] : vector<128x128xf32> to vector<128xf32>
    %8 = vector.shape_cast %7 : vector<128xf32> to vector<1x128xf32>
    %9 = tpu.concatenate %5, %8 in 0 : vector<1x128xf32>, vector<1x128xf32> -> vector<2x128xf32>
    %c0_7 = arith.constant 0 : index
    %c0_8 = arith.constant 0 : index
    %c0_9 = arith.constant 0 : index
    %10 = vector.load %arg4[%c0_7, %c0_8, %c0_9] : memref<1x2x128xf32, #tpu.memory_space<vmem>>, vector<1x2x128xf32>
    %11 = vector.shape_cast %10 : vector<1x2x128xf32> to vector<2x128xf32>
    %12 = vector.shape_cast %9 : vector<2x128xf32> to vector<1x2x128xf32>
    tpu.vector_store %arg4[%c0_7, %c0_8, %c0_9], %12 {strides = array<i32>} : memref<1x2x128xf32, #tpu.memory_space<vmem>>, vector<1x2x128xf32>,
    return
  }
  func.func @transform_0(%arg0: i32) -> (i32, i32) {
    %c0_i32 = arith.constant 0 : i32
    %c0_i32_0 = arith.constant 0 : i32
    return %arg0, %c0_i32 : i32, i32
  }
  func.func @transform_1(%arg0: i32) -> (i32, i32) {
    %c0_i32 = arith.constant 0 : i32
    %c0_i32_0 = arith.constant 0 : i32
    %c0_i32_1 = arith.constant 0 : i32
    return %c0_i32, %c0_i32_0 : i32, i32
  }
  func.func @transform_2(%arg0: i32) -> (i32, i32) {
    %c0_i32 = arith.constant 0 : i32
    %c0_i32_0 = arith.constant 0 : i32
    return %arg0, %c0_i32 : i32, i32
  }
  func.func @transform_3(%arg0: i32) -> (i32, i32, i32) {
    %c0_i32 = arith.constant 0 : i32
    %c0_i32_0 = arith.constant 0 : i32
    %c0_i32_1 = arith.constant 0 : i32
    return %arg0, %c0_i32, %c0_i32_0 : i32, i32, i32
  }
}

</mosaic_0001>

<bundles_post_ra>
// kernel: tpu_custom_call.1
= control target key start
LH: loop header
LB: loop body
LE: loop exit
PB: predicated region body
PF: predicated region fallthrough
CT: control target
= control target key end

     0   :  { %9 = vsyncpa [#allocation3], 0  ;;  %s1343_s0 = inlined_call_operand.hbm [shape: f32[512,128], index: 0, kind: input, shape index: {}]   ;;  %s1344_s1 = inlined_call_operand.hbm [shape: f32[128,128], index: 1, kind: input, shape index: {}]   ;;  %s1345_s2 = inlined_call_operand.hbm [shape: f32[512,128], index: 2, kind: output, shape index: {0}]   ;;  %s1346_s3 = inlined_call_operand.hbm [shape: f32[4,2,128], index: 3, kind: output, shape index: {1}]  }
   0x1   :  { %11 = vsyncpa [#allocation3 + $0x1], 0 }
   0x2   :  { %12 = vsyncpa [#allocation6], 0 }
   0x3   :  { %13 = vsyncpa [#allocation4], 0 }
   0x4   :  { %15 = vsyncpa [#allocation4 + $0x1], 0 }
   0x5   :  { %16 = vsyncpa [#allocation9], 0 }
   0x6   :  { %18 = vsyncpa [#allocation9 + $0x1], 0  ;;  %s1031_s12 = smov 0   ;;  %s1033_s13 = smov 0  }
   0x7   :  { %s1035_s14 = smov 0   ;;  %s1037_s15 = smov 0  }
   0x8 LB: > { %s1052_s16 = sadd.s32 4294967295, %s1001_s15   ;;  %s618_s17 = sadd.s32 4294967294, %s1001_s15   ;;  %s1001_s15 = sphi %s1037_s15, %s1365_s15   ;;  %s997_s14 = sphi %s1035_s14, %s1364_s14   ;;  %s993_s13 = sphi %s1033_s13, %s1363_s13   ;;  %s989_s12 = sphi %s1031_s12, %s1362_s12  }
   0x9   : > { %p44_p0 = scmp.ne.s32.totalorder %s993_s13, %s989_s12  ;;  %p1347_p1 = scmp.eq.s32.totalorder %s1052_s16, 0 }
   0xa   : > { %p95_p3 = scmp.eq.s32.totalorder %s618_s17, 3  ;;  %p619_p5 = scmp.ge.s32.totalorder %s1001_s15, 1 }
   0xb   : > { %p1061_p4 = por %p1347_p1, %p44_p0  ;;  %p128_p7 = scmp.lt.s32.totalorder %s1001_s15, 5 }
   0xc   : > { %p1066_p6 = por %p95_p3, %p44_p0  ;;  %s1003_s21 = smov [#allocation5]  }
   0xd   : > { %s1350_s18 = scalar_select %p1061_p4, 1, 0 }
   0xe   : > { %s1351_s19 = scalar_select %p1066_p6, 1, 0 }
   0xf   : > { %p1071_p8 = pnand %p619_p5, %p128_p7  ;;  %s140_s22 = sshll.u32 %s1003_s21, 4  ;;  %s141_s22 = int_to_ptr.vmem [resolvable:$true] %s140_s22 }
  0x10   : > { %s1084_s24 = sadd.s32 1, %s1001_s15   ;;  %s31_s25 = sadd.s32 1, %s997_s14 }
  0x11   : > { %s1352_s20 = scalar_select %p1071_p8, 1, 0 }
  0x12   : > { %p785_p9 = pneg %p1071_p8  ;;  %s28_s26 = ssub.s32 %s1001_s15, %s1084_s24 }
  0x13   : > { %s841_s29 = scalar_lea.hbm %s1344_s1, 2048 }
  0x14   : > { %p1079_p10 = pnand %p785_p9, %p1347_p1  ;;  %p842_p11 = scmp.ne.s32.totalorder %s1344_s1, %s841_s29 }
  0x15   : > { %p848_p3 = scmp.lt.u32.totalorder %s841_s29, %s1344_s1 }
  0x16   : > { %p843_p12 = pneg %p1079_p10 }
  0x18   : > { %p844_p13 = pnand %p843_p12, %p842_p11 }
  0x1a   : > { %p845_p0 = pneg %p844_p13 }
  0x1c   : > { %p850_p5 = pnand %p848_p3, %p845_p0 }
  0x1e   : > { %853 = shalt.err (!%p850_p5)
}
  0x1f   : > { %s854_s7 = scalar_lea.vmem %s141_s22, 2048  ;;  %p862_p2 = scmp.lt.s32.totalorder %s141_s22, %s141_s22 }
  0x20   : > { %p855_p7 = scmp.ne.s32.totalorder %s141_s22, %s854_s7  ;;  %p863_p6 = scmp.lt.s32.totalorder %s854_s7, %s854_s7 }
  0x22   : > { %p857_p9 = pnand %p855_p7, %p843_p12  ;;  %p864_p4 = por %p863_p6, %p862_p2 }
  0x24   : > { %p858_p1 = pneg %p857_p9 }
  0x26   : > { %p865_p8 = pnand %p864_p4, %p858_p1 }
  0x28   : > { %868 = shalt.err (!%p865_p8)
}
  0x29   : > { %s1004_s8 = smov 128   ;;  %s1005_s9 = smov 8  }
  0x2a   : > { %788 = dma.hbm_to_vmem [thread:$0]  (!%p1079_p10), %s1344_s1, 2048, %s141_s22, [#allocation6], %s1004_s8, %s1004_s8, %s1005_s9  }
  0x2b   : > { %p29_p1 = scmp.eq.s32.totalorder %s28_s26, 0  ;;  %p38_p2 = scmp.ne.s32.totalorder %s997_s14, %s993_s13 }
  0x2c   : > { %p39_p4 = scmp.eq.s32.totalorder %s1001_s15, 0  ;;  %p801_p6 = scmp.lt.s32.totalorder %s1001_s15, 4 }
  0x2d   : > { %s1113_s17 = scalar_select %p29_p1, %s997_s14, %s31_s25  }
  0x2e   : > { %p40_p8 = por %p39_p4, %p38_p2  ;;  %p1354_p11 = scmp.eq.s32.totalorder %s1052_s16, 3 }
  0x2f   : > { %s154_s23 = sand.u32 1, %s997_s14   ;;  %s637_s27 = sshll.u32 %s1001_s15, 11 }
  0x30   : > { %p1117_p12 = por %p1354_p11, %p38_p2  ;;  %s622_s28 = sshll.u32 %s154_s23, 7 }
  0x31   : > { %s1126_s4 = scalar_lea.hbm %s1343_s0, %s637_s27  ;;  %s158_s22 = scalar_lea.vmem [#allocation2], %s622_s28 }
  0x32   : > { %s165_s25 = sshll.u32 %s158_s22, 4  ;;  %p1128_p10 = pnand %p801_p6, %p40_p8  ;;  %s1132_s25 = int_to_ptr.vmem [resolvable:$true] %s165_s25 }
  0x33   : > { %s1134_s5 = scalar_lea.sflag [#allocation3], %s154_s23  ;;  %s869_s6 = scalar_lea.hbm %s1126_s4, 2048 }
  0x34   : > { %p870_p13 = scmp.ne.s32.totalorder %s1126_s4, %s869_s6  ;;  %p871_p0 = pneg %p1128_p10 }
  0x35   : > { %s874_s11 = scalar_lea.hbm %s1343_s0, 8192  ;;  %p875_p7 = scmp.lt.u32.totalorder %s1126_s4, %s1343_s0 }
  0x36   : > { %p872_p3 = pnand %p871_p0, %p870_p13  ;;  %p876_p9 = scmp.lt.u32.totalorder %s874_s11, %s869_s6 }
  0x37   : > { %p878_p2 = scmp.lt.u32.totalorder %s869_s6, %s1126_s4 }
  0x38   : > { %p873_p5 = pneg %p872_p3  ;;  %p877_p1 = por %p876_p9, %p875_p7 }
  0x3a   : > { %p879_p4 = por %p878_p2, %p877_p1 }
  0x3c   : > { %p880_p6 = pnand %p879_p4, %p873_p5 }
  0x3e   : > { %883 = shalt.err (!%p880_p6)
}
  0x3f   : > { %s884_s23 = scalar_lea.vmem %s1132_s25, 2048  ;;  %s1006_s29 = smov [#allocation2]  }
  0x40   : > { %p885_p8 = scmp.ne.s32.totalorder %s1132_s25, %s884_s23  ;;  %s889_s30 = sshll.u32 %s1006_s29, 4  ;;  %s890_s30 = int_to_ptr.vmem [resolvable:$false] %s889_s30 }
  0x41   : > { %s891_s22 = scalar_lea.vmem %s890_s30, 4096  ;;  %p892_p3 = scmp.lt.s32.totalorder %s1132_s25, %s890_s30 }
  0x42   : > { %p887_p11 = pnand %p885_p8, %p871_p0  ;;  %p893_p7 = scmp.lt.s32.totalorder %s891_s22, %s884_s23 }
  0x44   : > { %p888_p13 = pneg %p887_p11  ;;  %p894_p9 = por %p893_p7, %p892_p3 }
  0x46   : > { %p895_p1 = pnand %p894_p9, %p888_p13 }
  0x48   : > { %898 = shalt.err (!%p895_p1)
}
  0x49   : > { %792 = dma.hbm_to_vmem [thread:$0]  (!%p1128_p10), %s1126_s4, 2048, %s1132_s25, %s1134_s5, %s1004_s8, %s1004_s8, %s1005_s9  }
  0x4a   : > { %p1357_p0 = scmp.ne.s32.totalorder %s1352_s20, 0 }
  0x4b   : > { %s1168_s6 = sand.u32 (!%p1357_p0), 1, %s993_s13   ;;  %p1358_p5 = scmp.ne.s32.totalorder (!%p1357_p0), %s1350_s18, 0 }
  0x4c   : > { %177 = sbr.rel (%p1357_p0) target bundleno = 407 (0x197), region = 28  ;;  %s626_s7 = sshll.u32 (!%p1357_p0), %s1168_s6, 7 }
  0x4d   : > { %s180_s10 = scalar_lea.sflag (!%p1357_p0), [#allocation3], %s1168_s6  ;;  %s1174_s26 = scalar_lea.vmem (!%p1357_p0), [#allocation2], %s626_s7 }
  0x53   : > { %972 = dma.done.wait (%p1358_p5), %s180_s10, 2048  }
  0x54   : > { %974 = vsyncadd (%p1358_p5), %s180_s10, 4294965248  ;;  %p1359_p10 = scmp.eq.s32.totalorder %s1052_s16, 0 }
  0x56   : > { %976 = dma.done.wait (%p1359_p10), [#allocation6], 2048   ;;  %p1360_p2 = pmov %p1359_p10 }
  0x57   : > { %v233_v0 = vld [vmem:[#allocation5] sm:$0xff]  ;;  %v234_v1 = vld [vmem:[#allocation5 + $0x8] sm:$0xff]  ;;  %v235_v2 = vld [vmem:[#allocation5 + $0x10] sm:$0xff]  ;;  %s1204_s18 = scalar_lea.vmem [#allocation7], %s626_s7  ;;  %s638_s20 = sshll.u32 %s1052_s16, 11 }
  0x58   : > { %978 = vsyncadd (%p1360_p2), [#allocation6], 4294965248  ;;  %v727_v3 = vpack.c.bf16 %v234_v1, %v233_v0  ;;  %v236_v4 = vld [vmem:[#allocation5 + $0x18] sm:$0xff]  ;;  %v237_v6 = vld [vmem:[#allocation5 + $0x20] sm:$0xff]  ;;  %s490_s8 = sshll.u32 %s1204_s18, 4  ;;  %s1239_s25 = scalar_lea.hbm %s1345_s2, %s638_s20  ;;  %s1241_s8 = int_to_ptr.vmem [resolvable:$true] %s490_s8 }
  0x59   : > { %v731_v5 = vpack.c.bf16 %v236_v4, %v235_v2  ;;  %v238_v7 = vld [vmem:[#allocation5 + $0x28] sm:$0xff]  ;;  %v217_v9 = vld [vmem:[%s1174_s26] sm:$0xff]  ;;  %v239_v10 = vld [vmem:[#allocation5 + $0x30] sm:$0xff]  ;;  %s472_s5 = scalar_lea.sflag [#allocation4], %s1168_s6  ;;  %s899_s11 = scalar_lea.vmem %s1241_s8, 2048 }
  0x5a   : > { %728 = vmatprep.subr.bf16.mxu0 %v727_v3  ;;  %759 = vmatprep.subr.bf16.mxu1 %v727_v3  ;;  %v735_v8 = vpack.c.bf16 %v238_v7, %v237_v6  ;;  %v240_v11 = vld [vmem:[#allocation5 + $0x38] sm:$0xff]  ;;  %v225_v12 = vld [vmem:[%s1174_s26 + $0x40] sm:$0xff]  ;;  %v242_v15 = vld [vmem:[#allocation5 + $0x48] sm:$0xff]  ;;  %p900_p4 = scmp.ne.s32.totalorder %s1241_s8, %s899_s11  ;;  %s1007_s27 = smov [#allocation7]  }
  0x5b   : > { %730 = vmatpush3.bf16.msra.mxu0 %v727_v3  ;;  %767 = vmatpush3.bf16.msra.mxu1 %v727_v3  ;;  %v739_v13 = vpack.c.bf16 %v240_v11, %v239_v10  ;;  %v241_v14 = vld [vmem:[#allocation5 + $0x40] sm:$0xff]  ;;  %v243_v17 = vld [vmem:[#allocation5 + $0x50] sm:$0xff]  ;;  %v244_v18 = vld [vmem:[#allocation5 + $0x58] sm:$0xff]  ;;  %s903_s28 = sshll.u32 %s1007_s27, 4  ;;  %s904_s28 = int_to_ptr.vmem [resolvable:$false] %s903_s28 }
  0x5c   : > { %732 = vmatprep.subr.bf16.mxu0 %v731_v5  ;;  %760 = vmatprep.subr.bf16.mxu1 %v731_v5  ;;  %v743_v16 = vpack.c.bf16 %v242_v15, %v241_v14  ;;  %v747_v19 = vpack.c.bf16 %v244_v18, %v243_v17  ;;  %v245_v20 = vld [vmem:[#allocation5 + $0x60] sm:$0xff]  ;;  %v246_v21 = vld [vmem:[#allocation5 + $0x68] sm:$0xff]  ;;  %v247_v23 = vld [vmem:[#allocation5 + $0x70] sm:$0xff]  ;;  %p901_p6 = pnand %p900_p4, %p1117_p12  ;;  %s905_s23 = scalar_lea.vmem %s904_s28, 4096 }
  0x5d   : > { %703 = vmatprep.mubr.f32.mxu0 %v217_v9  ;;  %715 = vmatprep.mubr.f32.mxu1 %v225_v12  ;;  %v751_v22 = vpack.c.bf16 %v246_v21, %v245_v20  ;;  %v248_v24 = vld [vmem:[#allocation5 + $0x78] sm:$0xff]  ;;  %v218_v26 = vld [vmem:[%s1174_s26 + $0x8] sm:$0xff]  ;;  %v219_v28 = vld [vmem:[%s1174_s26 + $0x10] sm:$0xff]  ;;  %p906_p11 = scmp.lt.s32.totalorder %s1241_s8, %s904_s28  ;;  %p907_p13 = scmp.lt.s32.totalorder %s905_s23, %s899_s11 }
  0x5e   : > { %v755_v25 = vpack.c.bf16 %v248_v24, %v247_v23  ;;  %v226_v27 = vld [vmem:[%s1174_s26 + $0x48] sm:$0xff]  ;;  %v227_v29 = vld [vmem:[%s1174_s26 + $0x50] sm:$0xff]  ;;  %v220_v30 = vld [vmem:[%s1174_s26 + $0x18] sm:$0xff]  ;;  %p902_p8 = pneg %p901_p6 }
  0x5f   : > { %734 = vmatpush3.bf16.msra.mxu0 %v731_v5  ;;  %768 = vmatpush3.bf16.msra.mxu1 %v731_v5  ;;  %v228_v31 = vld [vmem:[%s1174_s26 + $0x58] sm:$0xff]  ;;  %v221_v32 = vld [vmem:[%s1174_s26 + $0x20] sm:$0xff]  ;;  %v222_v34 = vld [vmem:[%s1174_s26 + $0x28] sm:$0xff]  ;;  %p908_p3 = por %p907_p13, %p906_p11 }
  0x60   : > { %736 = vmatprep.subr.bf16.mxu0 %v735_v8  ;;  %761 = vmatprep.subr.bf16.mxu1 %v735_v8  ;;  %v229_v33 = vld [vmem:[%s1174_s26 + $0x60] sm:$0xff]  ;;  %v230_v35 = vld [vmem:[%s1174_s26 + $0x68] sm:$0xff]  ;;  %v223_v36 = vld [vmem:[%s1174_s26 + $0x30] sm:$0xff] }
  0x61   : > { %v231_v37 = vld [vmem:[%s1174_s26 + $0x70] sm:$0xff]  ;;  %v224_v38 = vld [vmem:[%s1174_s26 + $0x38] sm:$0xff]  ;;  %p909_p7 = pnand %p908_p3, %p902_p8 }
  0x62   : > { %v232_v39 = vld [vmem:[%s1174_s26 + $0x78] sm:$0xff] }
  0x63   : > { %738 = vmatpush3.bf16.msra.mxu0 %v735_v8  ;;  %769 = vmatpush3.bf16.msra.mxu1 %v735_v8 }
  0x64   : > { %740 = vmatprep.subr.bf16.mxu0 %v739_v13  ;;  %762 = vmatprep.subr.bf16.mxu1 %v739_v13 }
  0x67   : > { %742 = vmatpush3.bf16.msra.mxu0 %v739_v13  ;;  %770 = vmatpush3.bf16.msra.mxu1 %v739_v13 }
  0x68   : > { %744 = vmatprep.subr.bf16.mxu0 %v743_v16  ;;  %763 = vmatprep.subr.bf16.mxu1 %v743_v16 }
  0x6b   : > { %746 = vmatpush3.bf16.msra.mxu0 %v743_v16  ;;  %771 = vmatpush3.bf16.msra.mxu1 %v743_v16 }
  0x6c   : > { %748 = vmatprep.subr.bf16.mxu0 %v747_v19  ;;  %764 = vmatprep.subr.bf16.mxu1 %v747_v19 }
  0x6f   : > { %750 = vmatpush3.bf16.msra.mxu0 %v747_v19  ;;  %772 = vmatpush3.bf16.msra.mxu1 %v747_v19 }
  0x70   : > { %752 = vmatprep.subr.bf16.mxu0 %v751_v22  ;;  %765 = vmatprep.subr.bf16.mxu1 %v751_v22 }
  0x73   : > { %754 = vmatpush3.bf16.msra.mxu0 %v751_v22  ;;  %773 = vmatpush3.bf16.msra.mxu1 %v751_v22 }
  0x74   : > { %756 = vmatprep.subr.bf16.mxu0 %v755_v25  ;;  %766 = vmatprep.subr.bf16.mxu1 %v755_v25 }
  0x77   : > { %758 = vmatpush3.bf16.msra.mxu0 %v755_v25  ;;  %774 = vmatpush3.bf16.msra.mxu1 %v755_v25 }
  0x7a   : > { %704 = vmatmul.mubr.f32.vlgmr.msra.gmra.mrb[0].mxu0 %v218_v26  ;;  %716 = vmatmul.mubr.f32.vlgmr.msra.gmra.mrb[0].mxu1 %v226_v27 }
  0x7b   : > { %706 = vmatprep.mubr.f32.mxu0 %v219_v28  ;;  %718 = vmatprep.mubr.f32.mxu1 %v227_v29 }
  0x7e   : > { %707 = vmatmul.mubr.f32.gmra.mrb[2].mxu0 %v220_v30  ;;  %719 = vmatmul.mubr.f32.gmra.mrb[2].mxu1 %v228_v31 }
  0x7f   : > { %709 = vmatprep.mubr.f32.mxu0 %v221_v32  ;;  %721 = vmatprep.mubr.f32.mxu1 %v229_v33 }
  0x82   : > { %710 = vmatmul.mubr.f32.gmra.mrb[4].mxu0 %v222_v34  ;;  %722 = vmatmul.mubr.f32.gmra.mrb[4].mxu1 %v230_v35 }
  0x83   : > { %712 = vmatprep.mubr.f32.mxu0 %v223_v36  ;;  %724 = vmatprep.mubr.f32.mxu1 %v231_v37 }
  0x86   : > { %713 = vmatmul.mubr.f32.gmra.mrb[6].mxu0 %v224_v38  ;;  %725 = vmatmul.mubr.f32.gmra.mrb[6].mxu1 %v232_v39 }
 0x14d   : > { %v705_v40 = vpop.f32.mrb[0].mxu0  ;;  %v1200_v41 = vpop.f32.mrb[0].mxu1 }
 0x14e   : > { %395 = vst [vmem:[%s1204_s18 + $0x8] sm:$0xff] %v705_v40  ;;  %v432_v42 = vmul.f32 %v705_v40, %v705_v40  ;;  %v315_v43 = vpop.f32.mrb[1].mxu0  ;;  %403 = vst [vmem:[%s1204_s18 + $0x48] sm:$0xff] %v1200_v41  ;;  %v1209_v44 = vpop.f32.mrb[1].mxu1 }
 0x14f   : > { %394 = vst [vmem:[%s1204_s18] sm:$0xff] %v315_v43  ;;  %v410_v45 = vadd.f32 %v705_v40, %v315_v43  ;;  %v431_v46 = vmul.f32 %v315_v43, %v315_v43  ;;  %402 = vst [vmem:[%s1204_s18 + $0x40] sm:$0xff] %v1209_v44 }
 0x151   : > { %v447_v47 = vadd.f32 %v432_v42, %v431_v46  ;;  %v708_v48 = vpop.f32.mrb[2].mxu0  ;;  %v1214_v49 = vpop.f32.mrb[2].mxu1 }
 0x152   : > { %397 = vst [vmem:[%s1204_s18 + $0x18] sm:$0xff] %v708_v48  ;;  %v325_v50 = vpop.f32.mrb[3].mxu0  ;;  %405 = vst [vmem:[%s1204_s18 + $0x58] sm:$0xff] %v1214_v49  ;;  %v1219_v51 = vpop.f32.mrb[3].mxu1  ;;  %v434_v54 = vmul.f32 %v708_v48, %v708_v48 }
 0x153   : > { %396 = vst [vmem:[%s1204_s18 + $0x10] sm:$0xff] %v325_v50  ;;  %v411_v52 = vadd.f32 %v410_v45, %v325_v50  ;;  %v433_v53 = vmul.f32 %v325_v50, %v325_v50  ;;  %404 = vst [vmem:[%s1204_s18 + $0x50] sm:$0xff] %v1219_v51 }
 0x155   : > { %v448_v55 = vadd.f32 %v447_v47, %v433_v53  ;;  %v711_v56 = vpop.f32.mrb[4].mxu0  ;;  %v412_v57 = vadd.f32 %v708_v48, %v411_v52  ;;  %v1224_v58 = vpop.f32.mrb[4].mxu1 }
 0x156   : > { %399 = vst [vmem:[%s1204_s18 + $0x28] sm:$0xff] %v711_v56  ;;  %v335_v59 = vpop.f32.mrb[5].mxu0  ;;  %407 = vst [vmem:[%s1204_s18 + $0x68] sm:$0xff] %v1224_v58  ;;  %v1231_v60 = vpop.f32.mrb[5].mxu1  ;;  %v436_v0 = vmul.f32 %v711_v56, %v711_v56 }
 0x157   : > { %398 = vst [vmem:[%s1204_s18 + $0x20] sm:$0xff] %v335_v59  ;;  %v413_v61 = vadd.f32 %v412_v57, %v335_v59  ;;  %v435_v62 = vmul.f32 %v335_v59, %v335_v59  ;;  %v449_v63 = vadd.f32 %v448_v55, %v434_v54  ;;  %406 = vst [vmem:[%s1204_s18 + $0x60] sm:$0xff] %v1231_v60 }
 0x159   : > { %v450_v1 = vadd.f32 %v449_v63, %v435_v62  ;;  %v714_v2 = vpop.f32.mrb[6].mxu0  ;;  %v414_v3 = vadd.f32 %v711_v56, %v413_v61  ;;  %v1243_v4 = vpop.f32.mrb[6].mxu1 }
 0x15a   : > { %401 = vst [vmem:[%s1204_s18 + $0x38] sm:$0xff] %v714_v2  ;;  %v345_v5 = vpop.f32.mrb[7].mxu0  ;;  %409 = vst [vmem:[%s1204_s18 + $0x78] sm:$0xff] %v1243_v4  ;;  %v385_v6 = vpop.f32.mrb[7].mxu1 }
 0x15b   : > { %400 = vst [vmem:[%s1204_s18 + $0x30] sm:$0xff] %v345_v5  ;;  %v415_v7 = vadd.f32 %v414_v3, %v345_v5  ;;  %v437_v8 = vmul.f32 %v345_v5, %v345_v5  ;;  %v451_v9 = vadd.f32 %v450_v1, %v436_v0  ;;  %408 = vst [vmem:[%s1204_s18 + $0x70] sm:$0xff] %v385_v6 }
 0x15c   : > { %912 = shalt.err (!%p909_p7)
}
 0x15d   : > { %s913_s29 = scalar_lea.hbm %s1239_s25, 2048  ;;  %s917_s7 = scalar_lea.hbm %s1345_s2, 8192 }
 0x15e   : > { %p914_p9 = scmp.ne.s32.totalorder %s1239_s25, %s913_s29  ;;  %p918_p5 = scmp.lt.u32.totalorder %s1239_s25, %s1345_s2 }
 0x15f   : > { %p919_p10 = scmp.lt.u32.totalorder %s917_s7, %s913_s29  ;;  %p921_p4 = scmp.lt.u32.totalorder %s913_s29, %s1239_s25 }
 0x160   : > { %p915_p1 = pnand %p914_p9, %p1117_p12 }
 0x161   : > { %p920_p2 = por %p919_p10, %p918_p5 }
 0x162   : > { %p916_p0 = pneg %p915_p1 }
 0x163   : > { %p922_p6 = por %p921_p4, %p920_p2 }
 0x165   : > { %p923_p8 = pnand %p922_p6, %p916_p0 }
 0x167   : > { %926 = shalt.err (!%p923_p8)
}
 0x168   : > { %s1008_s18 = smov 128   ;;  %s1009_s20 = smov 8   ;;  %v438_v10 = vmul.f32 %v714_v2, %v714_v2  ;;  %v416_v11 = vadd.f32 %v714_v2, %v415_v7  ;;  %v452_v12 = vadd.f32 %v451_v9, %v437_v8  ;;  %v439_v13 = vmul.f32 %v1209_v44, %v1209_v44 }
 0x169   : > { %781 = dma.vmem_to_hbm [thread:$0]  (%p1117_p12), %s1241_s8, 2048, %s1239_s25, %s472_s5, %s1008_s18, %s1008_s18, %s1009_s20   ;;  %v440_v16 = vmul.f32 %v1200_v41, %v1200_v41  ;;  %v441_v19 = vmul.f32 %v1219_v51, %v1219_v51  ;;  %v442_v22 = vmul.f32 %v1214_v49, %v1214_v49  ;;  %v443_v25 = vmul.f32 %v1231_v60, %v1231_v60 }
 0x16a   : > { %v453_v14 = vadd.f32 %v452_v12, %v438_v10  ;;  %v417_v15 = vadd.f32 %v416_v11, %v1209_v44  ;;  %v444_v28 = vmul.f32 %v1224_v58, %v1224_v58  ;;  %v445_v31 = vmul.f32 %v385_v6, %v385_v6  ;;  %s629_s8 = sshll.u32 %s1168_s6, 1  ;;  %s634_s9 = sshll.u32 %s1052_s16, 5 }
 0x16b   : > { %v446_v34 = vmul.f32 %v1243_v4, %v1243_v4  ;;  %s214_s4 = scalar_lea.vmem [#allocation8], %s629_s8  ;;  %vm468_vm0 = vcmask 1040384   ;;  %s1300_s27 = scalar_lea.hbm %s1346_s3, %s634_s9 }
 0x16c   : > { %v454_v17 = vadd.f32 %v453_v14, %v439_v13  ;;  %v418_v18 = vadd.f32 %v1200_v41, %v417_v15  ;;  %s506_s25 = sshll.u32 %s214_s4, 4  ;;  %s477_s28 = scalar_lea.sflag [#allocation9], %s1168_s6  ;;  %s1302_s25 = int_to_ptr.vmem [resolvable:$true] %s506_s25 }
 0x16d   : > { %s927_s23 = scalar_lea.vmem %s1302_s25, 32  ;;  %s1010_s16 = smov [#allocation8]  }
 0x16e   : > { %v419_v20 = vadd.f32 %v418_v18, %v1219_v51  ;;  %v455_v21 = vadd.f32 %v454_v17, %v440_v16  ;;  %p928_p11 = scmp.ne.s32.totalorder %s1302_s25, %s927_s23  ;;  %s931_s29 = sshll.u32 %s1010_s16, 4  ;;  %s932_s29 = int_to_ptr.vmem [resolvable:$false] %s931_s29 }
 0x16f   : > { %s933_s30 = scalar_lea.vmem %s932_s29, 64  ;;  %p934_p7 = scmp.lt.s32.totalorder %s1302_s25, %s932_s29 }
 0x170   : > { %v456_v23 = vadd.f32 %v455_v21, %v441_v19  ;;  %v420_v24 = vadd.f32 %v1214_v49, %v419_v20  ;;  %p929_p13 = pnand %p928_p11, %p1117_p12  ;;  %p935_p9 = scmp.lt.s32.totalorder %s933_s30, %s927_s23 }
 0x172   : > { %v421_v26 = vadd.f32 %v420_v24, %v1231_v60  ;;  %v457_v27 = vadd.f32 %v456_v23, %v442_v22  ;;  %p930_p3 = pneg %p929_p13  ;;  %p936_p1 = por %p935_p9, %p934_p7 }
 0x174   : > { %v458_v29 = vadd.f32 %v457_v27, %v443_v25  ;;  %v422_v30 = vadd.f32 %v1224_v58, %v421_v26  ;;  %p937_p0 = pnand %p936_p1, %p930_p3 }
 0x176   : > { %v423_v32 = vadd.f32 %v422_v30, %v385_v6  ;;  %v459_v33 = vadd.f32 %v458_v29, %v444_v28 }
 0x178   : > { %v424_v35 = vadd.f32 %v1243_v4, %v423_v32  ;;  %v460_v36 = vadd.f32 %v459_v33, %v445_v31 }
 0x17a   : > { %v425_v37 = vrot.slane %v424_v35, 4  ;;  %v461_v38 = vadd.f32 %v460_v36, %v446_v34 }
 0x17c   : > { %v426_v39 = vadd.f32 %v425_v37, %v424_v35  ;;  %v462_v40 = vrot.slane %v461_v38, 4 }
 0x17e   : > { %v427_v41 = vrot.slane %v426_v39, 2  ;;  %v463_v42 = vadd.f32 %v462_v40, %v461_v38 }
 0x180   : > { %v428_v43 = vadd.f32 %v427_v41, %v426_v39  ;;  %v464_v44 = vrot.slane %v463_v42, 2 }
 0x182   : > { %v429_v45 = vrot.slane %v428_v43, 1  ;;  %v465_v46 = vadd.f32 %v464_v44, %v463_v42 }
 0x184   : > { %v466_v47 = vrot.slane %v465_v46, 1  ;;  %v430_v48 = vadd.f32 %v429_v45, %v428_v43 }
 0x186   : > { %v467_v49 = vadd.f32 %v466_v47, %v465_v46 }
 0x188   : > { %v469_v50 = vsel %vm468_vm0, %v430_v48, %v467_v49 }
 0x189   : > { %470 = vst [vmem:[%s214_s4] sm:$0x3] %v469_v50 }
 0x18a   : > { %940 = shalt.err (!%p937_p0)
}
 0x18b   : > { %s941_s6 = scalar_lea.hbm %s1300_s27, 32  ;;  %s945_s10 = scalar_lea.hbm %s1346_s3, 128 }
 0x18c   : > { %p942_p5 = scmp.ne.s32.totalorder %s1300_s27, %s941_s6  ;;  %p946_p4 = scmp.lt.u32.totalorder %s1300_s27, %s1346_s3 }
 0x18d   : > { %p947_p6 = scmp.lt.u32.totalorder %s945_s10, %s941_s6  ;;  %p949_p11 = scmp.lt.u32.totalorder %s941_s6, %s1300_s27 }
 0x18e   : > { %p943_p10 = pnand %p942_p5, %p1117_p12 }
 0x18f   : > { %p948_p8 = por %p947_p6, %p946_p4 }
 0x190   : > { %p944_p2 = pneg %p943_p10 }
 0x191   : > { %p950_p13 = por %p949_p11, %p948_p8 }
 0x193   : > { %p951_p3 = pnand %p950_p13, %p944_p2 }
 0x195   : > { %954 = shalt.err (!%p951_p3)
}
 0x196   : > { %782 = dma.vmem_to_hbm [thread:$0]  (%p1117_p12), %s1302_s25, 32, %s1300_s27, %s477_s28  }
 0x197 PF: > { %p803_p7 = scmp.ge.s32.totalorder %s1001_s15, 2  ;;  %s518_s20 = sand.u32 1, %s989_s12  }
 0x198   : > { %p1361_p9 = scmp.ne.s32.totalorder %s1351_s19, 0  ;;  %s519_s8 = scalar_lea.sflag [#allocation4], %s518_s20 }
 0x19a   : > { %p794_p1 = pnand %p803_p7, %p1361_p9 }
 0x19c   : > { %980 = dma.done.wait (!%p794_p1), %s519_s8, 2048  }
 0x19d   : > { %982 = vsyncadd (!%p794_p1), %s519_s8, 4294965248  ;;  %s528_s9 = scalar_lea.sflag [#allocation9], %s518_s20 }
 0x19e   : > { %984 = dma.done.wait (!%p794_p1), %s528_s9, 32  }
 0x19f   : > { %986 = vsyncadd (!%p794_p1), %s528_s9, 4294967264  ;;  %p21_p12 = scmp.ge.s32.totalorder %s1084_s24, 6   ;;  %s1362_s12 = smov %s993_s13 }
 0x1a0   : > { %s1363_s13 = smov %s997_s14  ;;  %s1364_s14 = smov %s1113_s17 }
 0x1a1   : > { %s1365_s15 = smov %s1084_s24  ;;  %23 = sbr.rel (!%p21_p12) target bundleno = 8 (0x8), region = 94 }
 0x1a8   :  { %533 = vsyncpa [#allocation3], 1 }
 0x1a9   :  { %535 = vsyncpa [#allocation3 + $0x1], 1 }
 0x1aa   :  { %536 = vsyncpa [#allocation6], 1 }
 0x1ab   :  { %537 = vsyncpa [#allocation4], 1 }
 0x1ac   :  { %539 = vsyncpa [#allocation4 + $0x1], 1 }
 0x1ad   :  { %540 = vsyncpa [#allocation9], 1 }
 0x1ae   :  { %542 = vsyncpa [#allocation9 + $0x1], 1 }

</bundles_post_ra>
